<compile_context>
chip_gen: v7x
topology: tpu7x:2x2x1
jax: 0.10.0
libtpu: 0.0.40
codegen_flags: <defaults>
</compile_context>

<pallas_src>
import numpy as np
import jax
import jax.numpy as jnp
from jax import lax
from jax.experimental import pallas as pl
from jax.experimental.pallas import tpu as pltpu


def _make_kernel(c_in, c_out, H, W, Wp, npad, mall, tap_offsets, compute_dtype):
    def kernel(x_ref, w_ref, b_ref, m_ref, o_ref, xpad_ref, tap_ref):
        # x_ref : (1, C_in, H, W)    one image, native NCHW (no host-side pad)
        # w_ref : (C_out, 9*C_in)    conv weight, tap-major / in-channel-minor
        # b_ref : (C_out, 1)         conv bias (f32)
        # m_ref : (1, MALL)          shared pooling mask, scaled by 1/(H*W)
        # o_ref : (1, 1, C_out)      pooled features for this image
        # xpad_ref : (C_in, NPAD)    f32 scratch: zero-padded image, flat spatial
        # tap_ref  : (9*C_in, MALL)  compute-dtype scratch: stacked tap operand

        # 1) Build the zero-padded image slab on-chip (pad=1 handled entirely in
        #    VMEM; removes the wrapper-side pad/transpose/reshape HBM passes).
        xpad_ref[...] = jnp.zeros_like(xpad_ref)
        for i in range(H):
            base = (i + 1) * Wp + 1
            xpad_ref[:, base:base + W] = x_ref[0, :, i, :]
        xflat = xpad_ref[...]                                     # (C_in, NPAD)

        # 2) Stack the 9 shifted views once -> a single deep contraction instead
        #    of nine C_in-deep dots (each lane-offset slice is used exactly once,
        #    folded into the stacked operand per the review).
        for t, off in enumerate(tap_offsets):
            tap_ref[t * c_in:(t + 1) * c_in, :] = (
                xflat[:, off:off + mall].astype(compute_dtype))

        # 3) conv3x3(pad=1) as ONE (C_out, 9*C_in) @ (9*C_in, MALL) MXU matmul
        #    with f32 accumulation, then bias + ReLU.
        y = jnp.dot(w_ref[...], tap_ref[...],
                    preferred_element_type=jnp.float32)           # (C_out, MALL)
        y = jnp.maximum(y + b_ref[...], 0.0)

        # 4) Per-image masked global-average pool: the shared (1, MALL) mask
        #    carries 1/(H*W) and zeros the pad/gap columns of the flat layout.
        #    (C_out=32 < 128 lanes on the store is negligible at this size; at
        #    backbone scale keep C_out lane-dense / padded to a multiple of 128.)
        pooled = lax.dot_general(m_ref[...], y, (((1,), (1,)), ((), ())),
                                 preferred_element_type=jnp.float32)  # (1, C_out)
        o_ref[0] = pooled

    return kernel


def feature_extractor(images_nchw, conv_w, conv_b, *, compute_dtype=jnp.float32):
    """images_nchw: (B, C_in, H, W) f32
       conv_w:      (C_out, C_in, 3, 3) f32 (PyTorch layout)
       conv_b:      (C_out,) f32
       returns:     (B, C_out) f32 pooled, flattened features."""
    B, C_in, H, W = images_nchw.shape
    C_out, C_in_w, kh, kw = conv_w.shape
    assert (C_in_w, kh, kw) == (C_in, 3, 3), "geometry below assumes 3x3/stride1/pad1"

    Hp, Wp = H + 2, W + 2
    npad = Hp * Wp                      # flattened padded spatial size per image
    # Specific to 3x3/stride-1/pad-1: last valid output base is (H-1)*Wp+(W-1);
    # the furthest tap read is +2*Wp+2 beyond it, which stays < npad.
    mall = (H - 1) * Wp + W             # contiguous range holding every valid output
    K = kh * kw * C_in
    tap_offsets = tuple(di * Wp + dj for di in range(kh) for dj in range(kw))

    # (C_out, C_in, kh, kw) -> (C_out, kh, kw, C_in) -> (C_out, K): column index
    # (di*kw + dj)*C_in + ci matches the kernel's tap/channel stacking order.
    w_big = jnp.transpose(conv_w, (0, 2, 3, 1)).reshape(C_out, K).astype(compute_dtype)
    b_col = conv_b.reshape(C_out, 1).astype(jnp.float32)

    # Shared per-image pooling mask (O(H*W), not O(B^2*H*W)): selects the real
    # interior conv outputs of the flat padded layout; folds in the mean scale.
    m2 = np.zeros((Hp, Wp), np.float32)
    m2[:H, :W] = 1.0 / float(H * W)
    mask = jnp.asarray(m2.reshape(1, npad)[:, :mall])

    kernel = _make_kernel(C_in, C_out, H, W, Wp, npad, mall, tap_offsets, compute_dtype)

    grid_spec = pltpu.PrefetchScalarGridSpec(
        num_scalar_prefetch=0,
        grid=(B,),                      # one image per step; >=2 parallel steps
                                        # let v7x use both TensorCores.
        in_specs=[
            pl.BlockSpec((1, C_in, H, W), lambda b: (b, 0, 0, 0)),  # native NCHW
            pl.BlockSpec((C_out, K), lambda b: (0, 0)),             # stays resident
            pl.BlockSpec((C_out, 1), lambda b: (0, 0)),
            pl.BlockSpec((1, mall), lambda b: (0, 0)),
        ],
        out_specs=pl.BlockSpec((1, 1, C_out), lambda b: (b, 0, 0)),
        scratch_shapes=[
            pltpu.VMEM((C_in, npad), jnp.float32),     # padded image slab
            pltpu.VMEM((K, mall), compute_dtype),      # stacked tap operand
        ],
    )

    # TODO(synk): the real module wraps a full pretrained backbone (ResNet-152
    # etc.).  At that scale: tile the positions axis as the LAST ("arbitrary")
    # grid dim with an f32 accumulator in scratch + pl.when init/finalize, keep
    # batch/spatial axes "parallel", keep C_out lane-dense (multiple of 128),
    # use bf16 operands everywhere, and size tiles ~half of v5e/v6e for v7x's
    # 64 MiB VMEM with an explicit vmem_limit_bytes budget.
    out = pl.pallas_call(
        kernel,
        out_shape=jax.ShapeDtypeStruct((B, 1, C_out), jnp.float32),
        grid_spec=grid_spec,
        compiler_params=pltpu.CompilerParams(
            dimension_semantics=("parallel",),
            vmem_limit_bytes=32 * 1024 * 1024,   # safe on v7x's 64 MiB physical VMEM
        ),
    )(images_nchw, w_big, b_col, mask)

    # flatten(B, -1), matching the PyTorch module's reshape.
    return out.reshape(B, C_out)


def _reference(images_nchw, conv_w, conv_b):
    """Pure-JAX reference: conv3x3(pad=1) + bias + ReLU + global avg pool + flatten."""
    y = lax.conv_general_dilated(
        images_nchw, conv_w, window_strides=(1, 1), padding="SAME",
        dimension_numbers=("NCHW", "OIHW", "NCHW"))
    y = jnp.maximum(y + conv_b[None, :, None, None], 0.0)
    return jnp.mean(y, axis=(2, 3))     # (B, C_out) == AdaptiveAvgPool + flatten


if __name__ == "__main__":
    key = jax.random.PRNGKey(0)
    k1, k2, k3 = jax.random.split(key, 3)

    B, C_in, H, W = 2, 4, 16, 16
    C_out = 32

    images = jax.random.normal(k1, (B, C_in, H, W), dtype=jnp.float32)
    conv_w = jax.random.normal(k2, (C_out, C_in, 3, 3), dtype=jnp.float32) * 0.1
    conv_b = jax.random.normal(k3, (C_out,), dtype=jnp.float32) * 0.1

    ref = jax.block_until_ready(_reference(images, conv_w, conv_b))

    # f32 path: tight tolerance against the f32 reference.
    feats = jax.block_until_ready(feature_extractor(images, conv_w, conv_b))
    assert feats.shape == (B, C_out)
    assert jnp.allclose(feats, ref, atol=1e-4, rtol=1e-4), "f32 mismatch vs reference"

    # bf16 conv operands (bf16-native MXU path for v5e/v6e/v7x), f32 accumulation;
    # looser tolerance per bf16 operand rounding.
    feats_bf16 = jax.block_until_ready(
        feature_extractor(images, conv_w, conv_b, compute_dtype=jnp.bfloat16))
    assert jnp.allclose(feats_bf16, ref, atol=3e-2, rtol=3e-2), "bf16 mismatch vs reference"

    print("KERNEL_OK")
</pallas_src>

<mosaic_0001>
module attributes {stable_mosaic.version = 11 : i64} {
  func.func @kernel(%arg0: i32, %arg1: memref<1x4x16x16xf32, #tpu.memory_space<vmem>>, %arg2: memref<32x36xf32, #tpu.memory_space<vmem>>, %arg3: memref<32x1xf32, #tpu.memory_space<vmem>>, %arg4: memref<1x286xf32, #tpu.memory_space<vmem>>, %arg5: memref<1x1x32xf32, #tpu.memory_space<vmem>>, %arg6: memref<4x324xf32, #tpu.memory_space<vmem>>, %arg7: memref<36x286xf32, #tpu.memory_space<vmem>>) attributes {dimension_semantics = [#tpu.dimension_semantics<parallel>], iteration_bounds = array<i64: 2>, scalar_prefetch = 0 : i64, scratch_operands = 2 : i64, tpu.core_type = #tpu.core_type<tc>, window_params = [{transform_indices = @transform_0, window_bounds = array<i64: 1, 4, 16, 16>}, {pipeline_mode = #tpu.pipeline_mode<synchronous>, transform_indices = @transform_1, window_bounds = array<i64: 32, 36>}, {pipeline_mode = #tpu.pipeline_mode<synchronous>, transform_indices = @transform_2, window_bounds = array<i64: 32, 1>}, {pipeline_mode = #tpu.pipeline_mode<synchronous>, transform_indices = @transform_3, window_bounds = array<i64: 1, 286>}, {transform_indices = @transform_4, window_bounds = array<i64: 1, 1, 32>}]} {
    %cst = arith.constant 0.000000e+00 : f32
    %0 = vector.broadcast %cst : f32 to vector<4x324xf32>
    %c0 = arith.constant 0 : index
    %c0_0 = arith.constant 0 : index
    %1 = vector.load %arg6[%c0, %c0_0] : memref<4x324xf32, #tpu.memory_space<vmem>>, vector<4x324xf32>
    tpu.vector_store %arg6[%c0, %c0_0], %0 {strides = array<i32>} : memref<4x324xf32, #tpu.memory_space<vmem>>, vector<4x324xf32>,
    %c0_1 = arith.constant 0 : index
    %c0_2 = arith.constant 0 : index
    %c0_3 = arith.constant 0 : index
    %c0_4 = arith.constant 0 : index
    %2 = vector.load %arg1[%c0_1, %c0_2, %c0_3, %c0_4] : memref<1x4x16x16xf32, #tpu.memory_space<vmem>>, vector<1x4x1x16xf32>
    %3 = vector.shape_cast %2 : vector<1x4x1x16xf32> to vector<4x16xf32>
    %c0_5 = arith.constant 0 : index
    %c19 = arith.constant 19 : index
    %4 = vector.load %arg6[%c0_5, %c19] : memref<4x324xf32, #tpu.memory_space<vmem>>, vector<4x16xf32>
    tpu.vector_store %arg6[%c0_5, %c19], %3 {strides = array<i32>} : memref<4x324xf32, #tpu.memory_space<vmem>>, vector<4x16xf32>,
    %c0_6 = arith.constant 0 : index
    %c0_7 = arith.constant 0 : index
    %c1 = arith.constant 1 : index
    %c0_8 = arith.constant 0 : index
    %5 = vector.load %arg1[%c0_6, %c0_7, %c1, %c0_8] : memref<1x4x16x16xf32, #tpu.memory_space<vmem>>, vector<1x4x1x16xf32>
    %6 = vector.shape_cast %5 : vector<1x4x1x16xf32> to vector<4x16xf32>
    %c0_9 = arith.constant 0 : index
    %c37 = arith.constant 37 : index
    %7 = vector.load %arg6[%c0_9, %c37] : memref<4x324xf32, #tpu.memory_space<vmem>>, vector<4x16xf32>
    tpu.vector_store %arg6[%c0_9, %c37], %6 {strides = array<i32>} : memref<4x324xf32, #tpu.memory_space<vmem>>, vector<4x16xf32>,
    %c0_10 = arith.constant 0 : index
    %c0_11 = arith.constant 0 : index
    %c2 = arith.constant 2 : index
    %c0_12 = arith.constant 0 : index
    %8 = vector.load %arg1[%c0_10, %c0_11, %c2, %c0_12] : memref<1x4x16x16xf32, #tpu.memory_space<vmem>>, vector<1x4x1x16xf32>
    %9 = vector.shape_cast %8 : vector<1x4x1x16xf32> to vector<4x16xf32>
    %c0_13 = arith.constant 0 : index
    %c55 = arith.constant 55 : index
    %10 = vector.load %arg6[%c0_13, %c55] : memref<4x324xf32, #tpu.memory_space<vmem>>, vector<4x16xf32>
    tpu.vector_store %arg6[%c0_13, %c55], %9 {strides = array<i32>} : memref<4x324xf32, #tpu.memory_space<vmem>>, vector<4x16xf32>,
    %c0_14 = arith.constant 0 : index
    %c0_15 = arith.constant 0 : index
    %c3 = arith.constant 3 : index
    %c0_16 = arith.constant 0 : index
    %11 = vector.load %arg1[%c0_14, %c0_15, %c3, %c0_16] : memref<1x4x16x16xf32, #tpu.memory_space<vmem>>, vector<1x4x1x16xf32>
    %12 = vector.shape_cast %11 : vector<1x4x1x16xf32> to vector<4x16xf32>
    %c0_17 = arith.constant 0 : index
    %c73 = arith.constant 73 : index
    %13 = vector.load %arg6[%c0_17, %c73] : memref<4x324xf32, #tpu.memory_space<vmem>>, vector<4x16xf32>
    tpu.vector_store %arg6[%c0_17, %c73], %12 {strides = array<i32>} : memref<4x324xf32, #tpu.memory_space<vmem>>, vector<4x16xf32>,
    %c0_18 = arith.constant 0 : index
    %c0_19 = arith.constant 0 : index
    %c4 = arith.constant 4 : index
    %c0_20 = arith.constant 0 : index
    %14 = vector.load %arg1[%c0_18, %c0_19, %c4, %c0_20] : memref<1x4x16x16xf32, #tpu.memory_space<vmem>>, vector<1x4x1x16xf32>
    %15 = vector.shape_cast %14 : vector<1x4x1x16xf32> to vector<4x16xf32>
    %c0_21 = arith.constant 0 : index
    %c91 = arith.constant 91 : index
    %16 = vector.load %arg6[%c0_21, %c91] : memref<4x324xf32, #tpu.memory_space<vmem>>, vector<4x16xf32>
    tpu.vector_store %arg6[%c0_21, %c91], %15 {strides = array<i32>} : memref<4x324xf32, #tpu.memory_space<vmem>>, vector<4x16xf32>,
    %c0_22 = arith.constant 0 : index
    %c0_23 = arith.constant 0 : index
    %c5 = arith.constant 5 : index
    %c0_24 = arith.constant 0 : index
    %17 = vector.load %arg1[%c0_22, %c0_23, %c5, %c0_24] : memref<1x4x16x16xf32, #tpu.memory_space<vmem>>, vector<1x4x1x16xf32>
    %18 = vector.shape_cast %17 : vector<1x4x1x16xf32> to vector<4x16xf32>
    %c0_25 = arith.constant 0 : index
    %c109 = arith.constant 109 : index
    %19 = vector.load %arg6[%c0_25, %c109] : memref<4x324xf32, #tpu.memory_space<vmem>>, vector<4x16xf32>
    tpu.vector_store %arg6[%c0_25, %c109], %18 {strides = array<i32>} : memref<4x324xf32, #tpu.memory_space<vmem>>, vector<4x16xf32>,
    %c0_26 = arith.constant 0 : index
    %c0_27 = arith.constant 0 : index
    %c6 = arith.constant 6 : index
    %c0_28 = arith.constant 0 : index
    %20 = vector.load %arg1[%c0_26, %c0_27, %c6, %c0_28] : memref<1x4x16x16xf32, #tpu.memory_space<vmem>>, vector<1x4x1x16xf32>
    %21 = vector.shape_cast %20 : vector<1x4x1x16xf32> to vector<4x16xf32>
    %c0_29 = arith.constant 0 : index
    %c127 = arith.constant 127 : index
    %22 = vector.load %arg6[%c0_29, %c127] : memref<4x324xf32, #tpu.memory_space<vmem>>, vector<4x16xf32>
    tpu.vector_store %arg6[%c0_29, %c127], %21 {strides = array<i32>} : memref<4x324xf32, #tpu.memory_space<vmem>>, vector<4x16xf32>,
    %c0_30 = arith.constant 0 : index
    %c0_31 = arith.constant 0 : index
    %c7 = arith.constant 7 : index
    %c0_32 = arith.constant 0 : index
    %23 = vector.load %arg1[%c0_30, %c0_31, %c7, %c0_32] : memref<1x4x16x16xf32, #tpu.memory_space<vmem>>, vector<1x4x1x16xf32>
    %24 = vector.shape_cast %23 : vector<1x4x1x16xf32> to vector<4x16xf32>
    %c0_33 = arith.constant 0 : index
    %c145 = arith.constant 145 : index
    %25 = vector.load %arg6[%c0_33, %c145] : memref<4x324xf32, #tpu.memory_space<vmem>>, vector<4x16xf32>
    tpu.vector_store %arg6[%c0_33, %c145], %24 {strides = array<i32>} : memref<4x324xf32, #tpu.memory_space<vmem>>, vector<4x16xf32>,
    %c0_34 = arith.constant 0 : index
    %c0_35 = arith.constant 0 : index
    %c8 = arith.constant 8 : index
    %c0_36 = arith.constant 0 : index
    %26 = vector.load %arg1[%c0_34, %c0_35, %c8, %c0_36] : memref<1x4x16x16xf32, #tpu.memory_space<vmem>>, vector<1x4x1x16xf32>
    %27 = vector.shape_cast %26 : vector<1x4x1x16xf32> to vector<4x16xf32>
    %c0_37 = arith.constant 0 : index
    %c163 = arith.constant 163 : index
    %28 = vector.load %arg6[%c0_37, %c163] : memref<4x324xf32, #tpu.memory_space<vmem>>, vector<4x16xf32>
    tpu.vector_store %arg6[%c0_37, %c163], %27 {strides = array<i32>} : memref<4x324xf32, #tpu.memory_space<vmem>>, vector<4x16xf32>,
    %c0_38 = arith.constant 0 : index
    %c0_39 = arith.constant 0 : index
    %c9 = arith.constant 9 : index
    %c0_40 = arith.constant 0 : index
    %29 = vector.load %arg1[%c0_38, %c0_39, %c9, %c0_40] : memref<1x4x16x16xf32, #tpu.memory_space<vmem>>, vector<1x4x1x16xf32>
    %30 = vector.shape_cast %29 : vector<1x4x1x16xf32> to vector<4x16xf32>
    %c0_41 = arith.constant 0 : index
    %c181 = arith.constant 181 : index
    %31 = vector.load %arg6[%c0_41, %c181] : memref<4x324xf32, #tpu.memory_space<vmem>>, vector<4x16xf32>
    tpu.vector_store %arg6[%c0_41, %c181], %30 {strides = array<i32>} : memref<4x324xf32, #tpu.memory_space<vmem>>, vector<4x16xf32>,
    %c0_42 = arith.constant 0 : index
    %c0_43 = arith.constant 0 : index
    %c10 = arith.constant 10 : index
    %c0_44 = arith.constant 0 : index
    %32 = vector.load %arg1[%c0_42, %c0_43, %c10, %c0_44] : memref<1x4x16x16xf32, #tpu.memory_space<vmem>>, vector<1x4x1x16xf32>
    %33 = vector.shape_cast %32 : vector<1x4x1x16xf32> to vector<4x16xf32>
    %c0_45 = arith.constant 0 : index
    %c199 = arith.constant 199 : index
    %34 = vector.load %arg6[%c0_45, %c199] : memref<4x324xf32, #tpu.memory_space<vmem>>, vector<4x16xf32>
    tpu.vector_store %arg6[%c0_45, %c199], %33 {strides = array<i32>} : memref<4x324xf32, #tpu.memory_space<vmem>>, vector<4x16xf32>,
    %c0_46 = arith.constant 0 : index
    %c0_47 = arith.constant 0 : index
    %c11 = arith.constant 11 : index
    %c0_48 = arith.constant 0 : index
    %35 = vector.load %arg1[%c0_46, %c0_47, %c11, %c0_48] : memref<1x4x16x16xf32, #tpu.memory_space<vmem>>, vector<1x4x1x16xf32>
    %36 = vector.shape_cast %35 : vector<1x4x1x16xf32> to vector<4x16xf32>
    %c0_49 = arith.constant 0 : index
    %c217 = arith.constant 217 : index
    %37 = vector.load %arg6[%c0_49, %c217] : memref<4x324xf32, #tpu.memory_space<vmem>>, vector<4x16xf32>
    tpu.vector_store %arg6[%c0_49, %c217], %36 {strides = array<i32>} : memref<4x324xf32, #tpu.memory_space<vmem>>, vector<4x16xf32>,
    %c0_50 = arith.constant 0 : index
    %c0_51 = arith.constant 0 : index
    %c12 = arith.constant 12 : index
    %c0_52 = arith.constant 0 : index
    %38 = vector.load %arg1[%c0_50, %c0_51, %c12, %c0_52] : memref<1x4x16x16xf32, #tpu.memory_space<vmem>>, vector<1x4x1x16xf32>
    %39 = vector.shape_cast %38 : vector<1x4x1x16xf32> to vector<4x16xf32>
    %c0_53 = arith.constant 0 : index
    %c235 = arith.constant 235 : index
    %40 = vector.load %arg6[%c0_53, %c235] : memref<4x324xf32, #tpu.memory_space<vmem>>, vector<4x16xf32>
    tpu.vector_store %arg6[%c0_53, %c235], %39 {strides = array<i32>} : memref<4x324xf32, #tpu.memory_space<vmem>>, vector<4x16xf32>,
    %c0_54 = arith.constant 0 : index
    %c0_55 = arith.constant 0 : index
    %c13 = arith.constant 13 : index
    %c0_56 = arith.constant 0 : index
    %41 = vector.load %arg1[%c0_54, %c0_55, %c13, %c0_56] : memref<1x4x16x16xf32, #tpu.memory_space<vmem>>, vector<1x4x1x16xf32>
    %42 = vector.shape_cast %41 : vector<1x4x1x16xf32> to vector<4x16xf32>
    %c0_57 = arith.constant 0 : index
    %c253 = arith.constant 253 : index
    %43 = vector.load %arg6[%c0_57, %c253] : memref<4x324xf32, #tpu.memory_space<vmem>>, vector<4x16xf32>
    tpu.vector_store %arg6[%c0_57, %c253], %42 {strides = array<i32>} : memref<4x324xf32, #tpu.memory_space<vmem>>, vector<4x16xf32>,
    %c0_58 = arith.constant 0 : index
    %c0_59 = arith.constant 0 : index
    %c14 = arith.constant 14 : index
    %c0_60 = arith.constant 0 : index
    %44 = vector.load %arg1[%c0_58, %c0_59, %c14, %c0_60] : memref<1x4x16x16xf32, #tpu.memory_space<vmem>>, vector<1x4x1x16xf32>
    %45 = vector.shape_cast %44 : vector<1x4x1x16xf32> to vector<4x16xf32>
    %c0_61 = arith.constant 0 : index
    %c271 = arith.constant 271 : index
    %46 = vector.load %arg6[%c0_61, %c271] : memref<4x324xf32, #tpu.memory_space<vmem>>, vector<4x16xf32>
    tpu.vector_store %arg6[%c0_61, %c271], %45 {strides = array<i32>} : memref<4x324xf32, #tpu.memory_space<vmem>>, vector<4x16xf32>,
    %c0_62 = arith.constant 0 : index
    %c0_63 = arith.constant 0 : index
    %c15 = arith.constant 15 : index
    %c0_64 = arith.constant 0 : index
    %47 = vector.load %arg1[%c0_62, %c0_63, %c15, %c0_64] : memref<1x4x16x16xf32, #tpu.memory_space<vmem>>, vector<1x4x1x16xf32>
    %48 = vector.shape_cast %47 : vector<1x4x1x16xf32> to vector<4x16xf32>
    %c0_65 = arith.constant 0 : index
    %c289 = arith.constant 289 : index
    %49 = vector.load %arg6[%c0_65, %c289] : memref<4x324xf32, #tpu.memory_space<vmem>>, vector<4x16xf32>
    tpu.vector_store %arg6[%c0_65, %c289], %48 {strides = array<i32>} : memref<4x324xf32, #tpu.memory_space<vmem>>, vector<4x16xf32>,
    %c0_66 = arith.constant 0 : index
    %c0_67 = arith.constant 0 : index
    %50 = vector.load %arg6[%c0_66, %c0_67] : memref<4x324xf32, #tpu.memory_space<vmem>>, vector<4x324xf32>
    %51 = vector.extract_strided_slice %50 {offsets = [0, 0], sizes = [4, 286], strides = [1, 1]} : vector<4x324xf32> to vector<4x286xf32>
    %c0_68 = arith.constant 0 : index
    %c0_69 = arith.constant 0 : index
    %52 = vector.load %arg7[%c0_68, %c0_69] : memref<36x286xf32, #tpu.memory_space<vmem>>, vector<4x286xf32>
    tpu.vector_store %arg7[%c0_68, %c0_69], %51 {strides = array<i32>} : memref<36x286xf32, #tpu.memory_space<vmem>>, vector<4x286xf32>,
    %53 = vector.extract_strided_slice %50 {offsets = [0, 1], sizes = [4, 286], strides = [1, 1]} : vector<4x324xf32> to vector<4x286xf32>
    %c4_70 = arith.constant 4 : index
    %c0_71 = arith.constant 0 : index
    %54 = vector.load %arg7[%c4_70, %c0_71] : memref<36x286xf32, #tpu.memory_space<vmem>>, vector<4x286xf32>
    tpu.vector_store %arg7[%c4_70, %c0_71], %53 {strides = array<i32>} : memref<36x286xf32, #tpu.memory_space<vmem>>, vector<4x286xf32>,
    %55 = vector.extract_strided_slice %50 {offsets = [0, 2], sizes = [4, 286], strides = [1, 1]} : vector<4x324xf32> to vector<4x286xf32>
    %c8_72 = arith.constant 8 : index
    %c0_73 = arith.constant 0 : index
    %56 = vector.load %arg7[%c8_72, %c0_73] : memref<36x286xf32, #tpu.memory_space<vmem>>, vector<4x286xf32>
    tpu.vector_store %arg7[%c8_72, %c0_73], %55 {strides = array<i32>} : memref<36x286xf32, #tpu.memory_space<vmem>>, vector<4x286xf32>,
    %57 = vector.extract_strided_slice %50 {offsets = [0, 18], sizes = [4, 286], strides = [1, 1]} : vector<4x324xf32> to vector<4x286xf32>
    %c12_74 = arith.constant 12 : index
    %c0_75 = arith.constant 0 : index
    %58 = vector.load %arg7[%c12_74, %c0_75] : memref<36x286xf32, #tpu.memory_space<vmem>>, vector<4x286xf32>
    tpu.vector_store %arg7[%c12_74, %c0_75], %57 {strides = array<i32>} : memref<36x286xf32, #tpu.memory_space<vmem>>, vector<4x286xf32>,
    %59 = vector.extract_strided_slice %50 {offsets = [0, 19], sizes = [4, 286], strides = [1, 1]} : vector<4x324xf32> to vector<4x286xf32>
    %c16 = arith.constant 16 : index
    %c0_76 = arith.constant 0 : index
    %60 = vector.load %arg7[%c16, %c0_76] : memref<36x286xf32, #tpu.memory_space<vmem>>, vector<4x286xf32>
    tpu.vector_store %arg7[%c16, %c0_76], %59 {strides = array<i32>} : memref<36x286xf32, #tpu.memory_space<vmem>>, vector<4x286xf32>,
    %61 = vector.extract_strided_slice %50 {offsets = [0, 20], sizes = [4, 286], strides = [1, 1]} : vector<4x324xf32> to vector<4x286xf32>
    %c20 = arith.constant 20 : index
    %c0_77 = arith.constant 0 : index
    %62 = vector.load %arg7[%c20, %c0_77] : memref<36x286xf32, #tpu.memory_space<vmem>>, vector<4x286xf32>
    tpu.vector_store %arg7[%c20, %c0_77], %61 {strides = array<i32>} : memref<36x286xf32, #tpu.memory_space<vmem>>, vector<4x286xf32>,
    %63 = vector.extract_strided_slice %50 {offsets = [0, 36], sizes = [4, 286], strides = [1, 1]} : vector<4x324xf32> to vector<4x286xf32>
    %c24 = arith.constant 24 : index
    %c0_78 = arith.constant 0 : index
    %64 = vector.load %arg7[%c24, %c0_78] : memref<36x286xf32, #tpu.memory_space<vmem>>, vector<4x286xf32>
    tpu.vector_store %arg7[%c24, %c0_78], %63 {strides = array<i32>} : memref<36x286xf32, #tpu.memory_space<vmem>>, vector<4x286xf32>,
    %65 = vector.extract_strided_slice %50 {offsets = [0, 37], sizes = [4, 286], strides = [1, 1]} : vector<4x324xf32> to vector<4x286xf32>
    %c28 = arith.constant 28 : index
    %c0_79 = arith.constant 0 : index
    %66 = vector.load %arg7[%c28, %c0_79] : memref<36x286xf32, #tpu.memory_space<vmem>>, vector<4x286xf32>
    tpu.vector_store %arg7[%c28, %c0_79], %65 {strides = array<i32>} : memref<36x286xf32, #tpu.memory_space<vmem>>, vector<4x286xf32>,
    %67 = vector.extract_strided_slice %50 {offsets = [0, 38], sizes = [4, 286], strides = [1, 1]} : vector<4x324xf32> to vector<4x286xf32>
    %c32 = arith.constant 32 : index
    %c0_80 = arith.constant 0 : index
    %68 = vector.load %arg7[%c32, %c0_80] : memref<36x286xf32, #tpu.memory_space<vmem>>, vector<4x286xf32>
    tpu.vector_store %arg7[%c32, %c0_80], %67 {strides = array<i32>} : memref<36x286xf32, #tpu.memory_space<vmem>>, vector<4x286xf32>,
    %c0_81 = arith.constant 0 : index
    %c0_82 = arith.constant 0 : index
    %69 = vector.load %arg2[%c0_81, %c0_82] : memref<32x36xf32, #tpu.memory_space<vmem>>, vector<32x36xf32>
    %c0_83 = arith.constant 0 : index
    %c0_84 = arith.constant 0 : index
    %70 = vector.load %arg7[%c0_83, %c0_84] : memref<36x286xf32, #tpu.memory_space<vmem>>, vector<36x286xf32>
    %cst_85 = arith.constant dense<0.000000e+00> : vector<32x286xf32>
    %71 = tpu.matmul %69, %70, %cst_85 {dimension_numbers = #tpu.dot_dimension_numbers<[1], [0], [0], [1], [0, 0, 1, 1], [], []>} : vector<32x36xf32>, vector<36x286xf32>, vector<32x286xf32> -> vector<32x286xf32>
    %c0_86 = arith.constant 0 : index
    %c0_87 = arith.constant 0 : index
    %72 = vector.load %arg3[%c0_86, %c0_87] : memref<32x1xf32, #tpu.memory_space<vmem>>, vector<32x1xf32>
    %73 = vector.broadcast %72 : vector<32x1xf32> to vector<32x286xf32>
    %74 = arith.addf %71, %73 : vector<32x286xf32>
    %cst_88 = arith.constant 0.000000e+00 : f32
    %75 = vector.broadcast %cst_88 : f32 to vector<32x286xf32>
    %76 = arith.maximumf %74, %75 : vector<32x286xf32>
    %c0_89 = arith.constant 0 : index
    %c0_90 = arith.constant 0 : index
    %77 = vector.load %arg4[%c0_89, %c0_90] : memref<1x286xf32, #tpu.memory_space<vmem>>, vector<1x286xf32>
    %cst_91 = arith.constant dense<0.000000e+00> : vector<1x32xf32>
    %78 = tpu.matmul %77, %76, %cst_91 {dimension_numbers = #tpu.dot_dimension_numbers<[1], [1], [0], [0], [0, 0, 1, 0], [], []>} : vector<1x286xf32>, vector<32x286xf32>, vector<1x32xf32> -> vector<1x32xf32>
    %c0_92 = arith.constant 0 : index
    %c0_93 = arith.constant 0 : index
    %c0_94 = arith.constant 0 : index
    %79 = vector.load %arg5[%c0_92, %c0_93, %c0_94] : memref<1x1x32xf32, #tpu.memory_space<vmem>>, vector<1x1x32xf32>
    %80 = vector.shape_cast %79 : vector<1x1x32xf32> to vector<1x32xf32>
    %81 = vector.shape_cast %78 : vector<1x32xf32> to vector<1x1x32xf32>
    tpu.vector_store %arg5[%c0_92, %c0_93, %c0_94], %81 {strides = array<i32>} : memref<1x1x32xf32, #tpu.memory_space<vmem>>, vector<1x1x32xf32>,
    return
  }
  func.func @transform_0(%arg0: i32) -> (i32, i32, i32, i32) {
    %c0_i32 = arith.constant 0 : i32
    %c0_i32_0 = arith.constant 0 : i32
    %c0_i32_1 = arith.constant 0 : i32
    %c0_i32_2 = arith.constant 0 : i32
    return %arg0, %c0_i32, %c0_i32_0, %c0_i32_1 : i32, i32, i32, i32
  }
  func.func @transform_1(%arg0: i32) -> (i32, i32) {
    %c0_i32 = arith.constant 0 : i32
    %c0_i32_0 = arith.constant 0 : i32
    %c0_i32_1 = arith.constant 0 : i32
    return %c0_i32, %c0_i32_0 : i32, i32
  }
  func.func @transform_2(%arg0: i32) -> (i32, i32) {
    %c0_i32 = arith.constant 0 : i32
    %c0_i32_0 = arith.constant 0 : i32
    %c0_i32_1 = arith.constant 0 : i32
    return %c0_i32, %c0_i32_0 : i32, i32
  }
  func.func @transform_3(%arg0: i32) -> (i32, i32) {
    %c0_i32 = arith.constant 0 : i32
    %c0_i32_0 = arith.constant 0 : i32
    %c0_i32_1 = arith.constant 0 : i32
    return %c0_i32, %c0_i32_0 : i32, i32
  }
  func.func @transform_4(%arg0: i32) -> (i32, i32, i32) {
    %c0_i32 = arith.constant 0 : i32
    %c0_i32_0 = arith.constant 0 : i32
    %c0_i32_1 = arith.constant 0 : i32
    return %arg0, %c0_i32, %c0_i32_0 : i32, i32, i32
  }
}

</mosaic_0001>

<bundles_post_ra>
// kernel: tpu_custom_call.1
= control target key start
LH: loop header
LB: loop body
LE: loop exit
PB: predicated region body
PF: predicated region fallthrough
CT: control target
= control target key end

     0   :  { %9 = vsyncpa [#allocation5], 0  ;;  %s1960_s0 = inlined_call_operand.hbm [shape: f32[2,4,16,16], index: 0, kind: input, shape index: {}]   ;;  %s1961_s1 = inlined_call_operand.vmem [shape: f32[32,36], index: 1, kind: input, shape index: {}]   ;;  %s1962_s2 = inlined_call_operand.vmem [shape: f32[32,1], index: 2, kind: input, shape index: {}]   ;;  %s1963_s3 = inlined_call_operand.vmem [shape: f32[1,286], index: 3, kind: input, shape index: {}]   ;;  %s1964_s4 = inlined_call_operand.hbm [shape: f32[2,1,32], index: 4, kind: output, shape index: {}]  }
   0x1   :  { %11 = vsyncpa [#allocation5 + $0x1], 0 }
   0x2   :  { %12 = vsyncpa [#allocation6], 0 }
   0x3   :  { %14 = vsyncpa [#allocation6 + $0x1], 0  ;;  %s1552_s15 = smov 0   ;;  %s1554_s16 = smov 0  }
   0x4   :  { %s1556_s17 = smov 0   ;;  %s1558_s18 = smov 0  }
   0x5 LB: > { %s1573_s19 = sadd.s32 4294967295, %s1496_s18   ;;  %s1222_s20 = sadd.s32 4294967294, %s1496_s18   ;;  %s1496_s18 = sphi %s1558_s18, %s1979_s18   ;;  %s1492_s17 = sphi %s1556_s17, %s1978_s17   ;;  %s1488_s16 = sphi %s1554_s16, %s1977_s16   ;;  %s1484_s15 = sphi %s1552_s15, %s1976_s15  }
   0x6   : > { %s1577_s21 = sadd.s32 1, %s1496_s18   ;;  %s27_s22 = sadd.s32 1, %s1492_s17 }
   0x7   : > { %s24_s23 = ssub.s32 %s1496_s18, %s1577_s21  ;;  %p34_p0 = scmp.ne.s32.totalorder %s1492_s17, %s1488_s16 }
   0x8   : > { %p25_p1 = scmp.eq.s32.totalorder %s24_s23, 0  ;;  %p35_p2 = scmp.eq.s32.totalorder %s1496_s18, 0 }
   0x9   : > { %p40_p3 = scmp.ne.s32.totalorder %s1488_s16, %s1484_s15  ;;  %p41_p4 = scmp.eq.s32.totalorder %s1573_s19, 0 }
   0xa   : > { %s1589_s24 = scalar_select %p25_p1, %s1492_s17, %s27_s22  }
   0xb   : > { %p1591_p5 = por %p35_p2, %p34_p0  ;;  %p1595_p6 = por %p41_p4, %p40_p3 }
   0xc   : > { %p127_p7 = scmp.eq.s32.totalorder %s1573_s19, 1  ;;  %p133_p8 = scmp.eq.s32.totalorder %s1222_s20, 1 }
   0xd   : > { %p1336_p10 = scmp.lt.s32.totalorder %s1496_s18, 2  ;;  %s162_s29 = sand.u32 1, %s1492_s17  }
   0xe   : > { %p1602_p11 = por %p127_p7, %p34_p0  ;;  %p1606_p12 = por %p133_p8, %p40_p3 }
   0xf   : > { %s1249_s30 = sshll.u32 %s1496_s18, 10  ;;  %s1225_s5 = sshll.u32 %s162_s29, 6 }
  0x10   : > { %s1968_s27 = scalar_select %p1602_p11, 1, 0 }
  0x11   : > { %s1969_s28 = scalar_select %p1606_p12, 1, 0 }
  0x12   : > { %s1615_s8 = scalar_lea.hbm %s1960_s0, %s1249_s30  ;;  %s166_s9 = scalar_lea.vmem [#allocation4], %s1225_s5 }
  0x13   : > { %s173_s10 = sshll.u32 %s166_s9, 4  ;;  %p1619_p13 = pnand %p1336_p10, %p1591_p5  ;;  %s1623_s10 = int_to_ptr.vmem [resolvable:$true] %s173_s10 }
  0x14   : > { %s1625_s12 = scalar_lea.sflag [#allocation5], %s162_s29  ;;  %s1400_s13 = scalar_lea.hbm %s1615_s8, 1024 }
  0x15   : > { %p1401_p0 = scmp.ne.s32.totalorder %s1615_s8, %s1400_s13  ;;  %p1402_p1 = pneg %p1619_p13 }
  0x16   : > { %s1405_s22 = scalar_lea.hbm %s1960_s0, 2048  ;;  %p1406_p4 = scmp.lt.u32.totalorder %s1615_s8, %s1960_s0 }
  0x17   : > { %p1403_p2 = pnand %p1402_p1, %p1401_p0  ;;  %p1407_p5 = scmp.lt.u32.totalorder %s1405_s22, %s1400_s13 }
  0x18   : > { %p1409_p8 = scmp.lt.u32.totalorder %s1400_s13, %s1615_s8 }
  0x19   : > { %p1404_p3 = pneg %p1403_p2  ;;  %p1408_p7 = por %p1407_p5, %p1406_p4 }
  0x1b   : > { %p1410_p10 = por %p1409_p8, %p1408_p7 }
  0x1d   : > { %p1411_p9 = pnand %p1410_p10, %p1404_p3 }
  0x1f   : > { %1414 = shalt.err (!%p1411_p9)
}
  0x20   : > { %s1415_s29 = scalar_lea.vmem %s1623_s10, 1024  ;;  %s1498_s30 = smov [#allocation4]  }
  0x21   : > { %p1416_p0 = scmp.ne.s32.totalorder %s1623_s10, %s1415_s29  ;;  %s1420_s5 = sshll.u32 %s1498_s30, 4  ;;  %s1421_s5 = int_to_ptr.vmem [resolvable:$false] %s1420_s5 }
  0x22   : > { %s1422_s6 = scalar_lea.vmem %s1421_s5, 2048  ;;  %p1423_p11 = scmp.lt.s32.totalorder %s1623_s10, %s1421_s5 }
  0x23   : > { %p1418_p2 = pnand %p1416_p0, %p1402_p1  ;;  %p1424_p4 = scmp.lt.s32.totalorder %s1422_s6, %s1415_s29 }
  0x25   : > { %p1419_p12 = pneg %p1418_p2  ;;  %p1425_p5 = por %p1424_p4, %p1423_p11 }
  0x27   : > { %p1426_p7 = pnand %p1425_p5, %p1419_p12 }
  0x29   : > { %1429 = shalt.err (!%p1426_p7)
}
  0x2a   : > { %s1499_s7 = smov 128   ;;  %s1500_s9 = smov 8  }
  0x2b   : > { %1331 = dma.hbm_to_vmem [thread:$0]  (!%p1619_p13), %s1615_s8, 1024, %s1623_s10, %s1625_s12, %s1499_s7, %s1499_s7, %s1500_s9  }
  0x2c   : > { %p1228_p9 = scmp.ge.s32.totalorder %s1496_s18, 1  ;;  %p181_p1 = scmp.lt.s32.totalorder %s1496_s18, 3 }
  0x2e   : > { %p182_p3 = pnand %p1228_p9, %p181_p1 }
  0x2f   : > { %s1656_s13 = sand.u32 (!%p182_p3), 1, %s1488_s16  }
  0x30   : > { %185 = sbr.rel (%p182_p3) target bundleno = 857 (0x359), region = 36  ;;  %s1229_s14 = sshll.u32 (!%p182_p3), %s1656_s13, 6 }
  0x31   : > { %s188_s20 = scalar_lea.sflag (!%p182_p3), [#allocation5], %s1656_s13  ;;  %s1660_s22 = scalar_lea.vmem (!%p182_p3), [#allocation4], %s1229_s14 }
  0x37   : > { %1475 = dma.done.wait (%p1595_p6), %s188_s20, 1024  }
  0x38   : > { %1477 = vsyncadd (%p1595_p6), %s188_s20, 4294966272  ;;  %v1501_v0 = vmov 0.0   ;;  %vm227_vm0 = vcmask 1041409   ;;  %vm229_vm1 = vcmask 1045509   ;;  %vm232_vm2 = vcmask 1042434   ;;  %s1502_s26 = smov 55  }
  0x39   : > { %215 = vst [vmem:[#allocation2] sm:$0xff] %v1501_v0  ;;  %848 = vmatprep.mubr.f32.mxu0 %v1501_v0  ;;  %vm234_vm3 = vcmask 1046534   ;;  %v268_v1 = vld [vmem:[%s1660_s22 + $0x2] sm:$0x1]  ;;  %v269_v2 = vld [vmem:[%s1660_s22 + $0x12] sm:$0x1] }
  0x3a   : > { %v270_v3 = vld [vmem:[%s1660_s22 + $0x22] sm:$0x1]  ;;  %v271_v4 = vld [vmem:[%s1660_s22 + $0x32] sm:$0x1]  ;;  %v276_v5 = vrot.slane %v269_v2, 7  ;;  %vm237_vm4 = vcmask 1043459  }
  0x3b   : > { %v279_v6 = vrot.slane %v270_v3, 6  ;;  %v218_v7 = vld [vmem:[%s1660_s22] sm:$0x1]  ;;  %v282_v8 = vrot.slane %v271_v4, 5  ;;  %v219_v9 = vld [vmem:[%s1660_s22 + $0x10] sm:$0x1] }
  0x3c   : > { %v220_v10 = vld [vmem:[%s1660_s22 + $0x20] sm:$0x1]  ;;  %v277_v11 = vsel %vm227_vm0, %v276_v5, %v268_v1  ;;  %v221_v12 = vld [vmem:[%s1660_s22 + $0x30] sm:$0x1]  ;;  %v226_v13 = vrot.slane %v219_v9, 7  ;;  %vm239_vm5 = vcmask 1047559  }
  0x3d   : > { %v231_v14 = vrot.slane %v220_v10, 6  ;;  %v290_v15 = vld [vmem:[%s1660_s22 + $0x3] sm:$0x1]  ;;  %v278_v16 = vsel %vm229_vm1, %v276_v5, %v277_v11  ;;  %v236_v17 = vrot.slane %v221_v12, 5  ;;  %v291_v18 = vld [vmem:[%s1660_s22 + $0x13] sm:$0x1] }
  0x3e   : > { %v292_v19 = vld [vmem:[%s1660_s22 + $0x23] sm:$0x1]  ;;  %v280_v20 = vsel %vm232_vm2, %v279_v6, %v278_v16  ;;  %v228_v21 = vsel %vm227_vm0, %v226_v13, %v218_v7  ;;  %v293_v22 = vld [vmem:[%s1660_s22 + $0x33] sm:$0x1]  ;;  %v298_v23 = vrot.slane %v291_v18, 7  ;;  %s1503_s8 = smov 19  }
  0x3f   : > { %v301_v24 = vrot.slane %v292_v19, 6  ;;  %v246_v25 = vld [vmem:[%s1660_s22 + $0x1] sm:$0x1]  ;;  %v281_v26 = vsel %vm234_vm3, %v279_v6, %v280_v20  ;;  %v230_v27 = vsel %vm229_vm1, %v226_v13, %v228_v21  ;;  %v304_v28 = vrot.slane %v293_v22, 5  ;;  %v247_v29 = vld [vmem:[%s1660_s22 + $0x11] sm:$0x1] }
  0x40   : > { %v248_v30 = vld [vmem:[%s1660_s22 + $0x21] sm:$0x1]  ;;  %v283_v31 = vsel %vm237_vm4, %v282_v8, %v281_v26  ;;  %v233_v32 = vsel %vm232_vm2, %v231_v14, %v230_v27  ;;  %v299_v33 = vsel %vm227_vm0, %v298_v23, %v290_v15  ;;  %v249_v34 = vld [vmem:[%s1660_s22 + $0x31] sm:$0x1]  ;;  %v254_v35 = vrot.slane %v247_v29, 7  ;;  %s1504_s10 = smov 73  }
  0x41   : > { %v284_v36 = vsel %vm239_vm5, %v282_v8, %v283_v31  ;;  %v235_v37 = vsel %vm234_vm3, %v231_v14, %v233_v32  ;;  %v300_v38 = vsel %vm229_vm1, %v298_v23, %v299_v33  ;;  %v257_v39 = vrot.slane %v248_v30, 6  ;;  %v313_v40 = vld [vmem:[%s1660_s22 + $0x14] sm:$0x1]  ;;  %v314_v41 = vld [vmem:[%s1660_s22 + $0x24] sm:$0x1]  ;;  %s1505_s11 = smov 37  }
  0x42   : > { %285 = vrot.lane.b32.xlu1 %v284_v36, %s1502_s26  ;;  %v238_v42 = vsel %vm237_vm4, %v236_v17, %v235_v37  ;;  %v302_v43 = vsel %vm232_vm2, %v301_v24, %v300_v38  ;;  %v255_v44 = vsel %vm227_vm0, %v254_v35, %v246_v25  ;;  %v260_v45 = vrot.slane %v249_v34, 5  ;;  %v312_v46 = vld [vmem:[%s1660_s22 + $0x4] sm:$0x1]  ;;  %v315_v47 = vld [vmem:[%s1660_s22 + $0x34] sm:$0x1]  ;;  %s1506_s12 = smov 91  }
  0x43   : > { %v240_v48 = vsel %vm239_vm5, %v236_v17, %v238_v42  ;;  %v303_v49 = vsel %vm234_vm3, %v301_v24, %v302_v43  ;;  %v256_v50 = vsel %vm229_vm1, %v254_v35, %v255_v44  ;;  %v320_v51 = vrot.slane %v313_v40, 7  ;;  %v357_v52 = vld [vmem:[%s1660_s22 + $0x16] sm:$0x1]  ;;  %v358_v53 = vld [vmem:[%s1660_s22 + $0x26] sm:$0x1]  ;;  %s1507_s23 = smov 127  }
  0x44   : > { %241 = vrot.lane.b32.xlu0 %v240_v48, %s1503_s8  ;;  %v305_v54 = vsel %vm237_vm4, %v304_v28, %v303_v49  ;;  %v258_v55 = vsel %vm232_vm2, %v257_v39, %v256_v50  ;;  %v323_v56 = vrot.slane %v314_v41, 6  ;;  %v326_v57 = vrot.slane %v315_v47, 5  ;;  %v356_v58 = vld [vmem:[%s1660_s22 + $0x6] sm:$0x1]  ;;  %v359_v59 = vld [vmem:[%s1660_s22 + $0x36] sm:$0x1] }
  0x45   : > { %v306_v60 = vsel %vm239_vm5, %v304_v28, %v305_v54  ;;  %v259_v61 = vsel %vm234_vm3, %v257_v39, %v258_v55  ;;  %v321_v62 = vsel %vm227_vm0, %v320_v51, %v312_v46  ;;  %v364_v63 = vrot.slane %v357_v52, 7  ;;  %v384_v1 = vld [vmem:[%s1660_s22 + $0x17] sm:$0x1]  ;;  %v385_v2 = vld [vmem:[%s1660_s22 + $0x27] sm:$0x1]  ;;  %s1508_s25 = smov 17  }
  0x46   : > { %307 = vrot.lane.b32.xlu1 %v306_v60, %s1504_s10  ;;  %v261_v3 = vsel %vm237_vm4, %v260_v45, %v259_v61  ;;  %v322_v4 = vsel %vm229_vm1, %v320_v51, %v321_v62  ;;  %v367_v5 = vrot.slane %v358_v53, 6  ;;  %v370_v6 = vrot.slane %v359_v59, 5  ;;  %v383_v7 = vld [vmem:[%s1660_s22 + $0x7] sm:$0x1]  ;;  %v386_v8 = vld [vmem:[%s1660_s22 + $0x37] sm:$0x1] }
  0x47   : > { %v262_v9 = vsel %vm239_vm5, %v260_v45, %v261_v3  ;;  %v324_v10 = vsel %vm232_vm2, %v323_v56, %v322_v4  ;;  %v365_v11 = vsel %vm227_vm0, %v364_v63, %v356_v58  ;;  %v391_v12 = vrot.slane %v384_v1, 7  ;;  %v335_v13 = vld [vmem:[%s1660_s22 + $0x15] sm:$0x1]  ;;  %v336_v14 = vld [vmem:[%s1660_s22 + $0x25] sm:$0x1]  ;;  %s1509_s29 = smov 109  }
  0x48   : > { %263 = vrot.lane.b32.xlu0 %v262_v9, %s1505_s11  ;;  %v325_v15 = vsel %vm234_vm3, %v323_v56, %v324_v10  ;;  %v366_v16 = vsel %vm229_vm1, %v364_v63, %v365_v11  ;;  %v394_v17 = vrot.slane %v385_v2, 6  ;;  %v397_v18 = vrot.slane %v386_v8, 5  ;;  %v334_v19 = vld [vmem:[%s1660_s22 + $0x5] sm:$0x1]  ;;  %v337_v20 = vld [vmem:[%s1660_s22 + $0x35] sm:$0x1] }
  0x49   : > { %v327_v21 = vsel %vm237_vm4, %v326_v57, %v325_v15  ;;  %v368_v22 = vsel %vm232_vm2, %v367_v5, %v366_v16  ;;  %v392_v23 = vsel %vm227_vm0, %v391_v12, %v383_v7  ;;  %v342_v24 = vrot.slane %v335_v13, 7  ;;  %v428_v25 = vld [vmem:[%s1660_s22 + $0x19] sm:$0x1]  ;;  %v429_v30 = vld [vmem:[%s1660_s22 + $0x29] sm:$0x1]  ;;  %s1510_s30 = smov 53  }
  0x4a   : > { %v328_v26 = vsel %vm239_vm5, %v326_v57, %v327_v21  ;;  %v369_v27 = vsel %vm234_vm3, %v367_v5, %v368_v22  ;;  %v393_v28 = vsel %vm229_vm1, %v391_v12, %v392_v23  ;;  %v345_v29 = vrot.slane %v336_v14, 6  ;;  %v430_v31 = vld [vmem:[%s1660_s22 + $0x39] sm:$0x1]  ;;  %v427_v36 = vld [vmem:[%s1660_s22 + $0x9] sm:$0x1]  ;;  %s1511_s5 = smov 35  }
  0x4b   : > { %329 = vrot.lane.b32.xlu1 %v328_v26, %s1506_s12  ;;  %v371_v32 = vsel %vm237_vm4, %v370_v6, %v369_v27  ;;  %v395_v33 = vsel %vm232_vm2, %v394_v17, %v393_v28  ;;  %v343_v34 = vsel %vm227_vm0, %v342_v24, %v334_v19  ;;  %v348_v35 = vrot.slane %v337_v20, 5  ;;  %v406_v37 = vld [vmem:[%s1660_s22 + $0x18] sm:$0x1]  ;;  %v407_v42 = vld [vmem:[%s1660_s22 + $0x28] sm:$0x1]  ;;  %s1512_s6 = smov 125  }
  0x4c   : > { %v372_v38 = vsel %vm239_vm5, %v370_v6, %v371_v32  ;;  %v396_v39 = vsel %vm234_vm3, %v394_v17, %v395_v33  ;;  %v344_v40 = vsel %vm229_vm1, %v342_v24, %v343_v34  ;;  %v435_v41 = vrot.slane %v428_v25, 7  ;;  %v408_v43 = vld [vmem:[%s1660_s22 + $0x38] sm:$0x1]  ;;  %v405_v48 = vld [vmem:[%s1660_s22 + $0x8] sm:$0x1]  ;;  %s1513_s7 = smov 71  }
  0x4d   : > { %373 = vrot.lane.b32.xlu0 %v372_v38, %s1507_s23  ;;  %v398_v44 = vsel %vm237_vm4, %v397_v18, %v396_v39  ;;  %v346_v45 = vsel %vm232_vm2, %v345_v29, %v344_v40  ;;  %v438_v46 = vrot.slane %v429_v30, 6  ;;  %v441_v47 = vrot.slane %v430_v31, 5  ;;  %v516_v49 = vld [vmem:[%s1660_s22 + $0x1d] sm:$0x1]  ;;  %v517_v54 = vld [vmem:[%s1660_s22 + $0x2d] sm:$0x1] }
  0x4e   : > { %v399_v50 = vsel %vm239_vm5, %v397_v18, %v398_v44  ;;  %v347_v51 = vsel %vm234_vm3, %v345_v29, %v346_v45  ;;  %v436_v52 = vsel %vm227_vm0, %v435_v41, %v427_v36  ;;  %v413_v53 = vrot.slane %v406_v37, 7  ;;  %v518_v55 = vld [vmem:[%s1660_s22 + $0x3d] sm:$0x1]  ;;  %v515_v60 = vld [vmem:[%s1660_s22 + $0xd] sm:$0x1]  ;;  %s1514_s9 = smov 89  }
  0x4f   : > { %400 = vrot.lane.b32.xlu1 %v399_v50, %s1508_s25  ;;  %v349_v56 = vsel %vm237_vm4, %v348_v35, %v347_v51  ;;  %v437_v57 = vsel %vm229_vm1, %v435_v41, %v436_v52  ;;  %v416_v58 = vrot.slane %v407_v42, 6  ;;  %v419_v59 = vrot.slane %v408_v43, 5  ;;  %v450_v61 = vld [vmem:[%s1660_s22 + $0x1a] sm:$0x1]  ;;  %v451_v3 = vld [vmem:[%s1660_s22 + $0x2a] sm:$0x1] }
  0x50   : > { %v350_v62 = vsel %vm239_vm5, %v348_v35, %v349_v56  ;;  %v439_v63 = vsel %vm232_vm2, %v438_v46, %v437_v57  ;;  %v414_v1 = vsel %vm227_vm0, %v413_v53, %v405_v48  ;;  %v523_v2 = vrot.slane %v516_v49, 7  ;;  %v449_v8 = vld [vmem:[%s1660_s22 + $0xa] sm:$0x1]  ;;  %v452_v9 = vld [vmem:[%s1660_s22 + $0x3a] sm:$0x1]  ;;  %s1515_s14 = smov 107  }
  0x51   : > { %351 = vrot.lane.b32.xlu0 %v350_v62, %s1509_s29  ;;  %v440_v4 = vsel %vm234_vm3, %v438_v46, %v439_v63  ;;  %v415_v5 = vsel %vm229_vm1, %v413_v53, %v414_v1  ;;  %v526_v6 = vrot.slane %v517_v54, 6  ;;  %v529_v7 = vrot.slane %v518_v55, 5  ;;  %v472_v14 = vld [vmem:[%s1660_s22 + $0x1b] sm:$0x1]  ;;  %v473_v19 = vld [vmem:[%s1660_s22 + $0x2b] sm:$0x1] }
  0x52   : > { %v442_v10 = vsel %vm237_vm4, %v441_v47, %v440_v4  ;;  %v417_v11 = vsel %vm232_vm2, %v416_v58, %v415_v5  ;;  %v524_v12 = vsel %vm227_vm0, %v523_v2, %v515_v60  ;;  %v457_v13 = vrot.slane %v450_v61, 7  ;;  %v474_v20 = vld [vmem:[%s1660_s22 + $0x3b] sm:$0x1]  ;;  %v471_v25 = vld [vmem:[%s1660_s22 + $0xb] sm:$0x1]  ;;  %s1516_s20 = smov 15  }
  0x53   : > { %v443_v15 = vsel %vm239_vm5, %v441_v47, %v442_v10  ;;  %v418_v16 = vsel %vm234_vm3, %v416_v58, %v417_v11  ;;  %v525_v17 = vsel %vm229_vm1, %v523_v2, %v524_v12  ;;  %v460_v18 = vrot.slane %v451_v3, 6  ;;  %v494_v26 = vld [vmem:[%s1660_s22 + $0x1c] sm:$0x1]  ;;  %v495_v31 = vld [vmem:[%s1660_s22 + $0x2c] sm:$0x1]  ;;  %s1518_s26 = smov 126  }
  0x54   : > { %444 = vrot.lane.b32.xlu1 %v443_v15, %s1510_s30  ;;  %v420_v21 = vsel %vm237_vm4, %v419_v59, %v418_v16  ;;  %v527_v22 = vsel %vm232_vm2, %v526_v6, %v525_v17  ;;  %v458_v23 = vsel %vm227_vm0, %v457_v13, %v449_v8  ;;  %v463_v24 = vrot.slane %v452_v9, 5  ;;  %v496_v32 = vld [vmem:[%s1660_s22 + $0x3c] sm:$0x1]  ;;  %v493_v37 = vld [vmem:[%s1660_s22 + $0xc] sm:$0x1]  ;;  %s1519_s8 = smov 108  }
  0x55   : > { %v421_v27 = vsel %vm239_vm5, %v419_v59, %v420_v21  ;;  %v528_v28 = vsel %vm234_vm3, %v526_v6, %v527_v22  ;;  %v459_v29 = vsel %vm229_vm1, %v457_v13, %v458_v23  ;;  %v479_v30 = vrot.slane %v472_v14, 7  ;;  %v543_v38 = vld [vmem:[%s1660_s22 + $0x1e] sm:$0x1]  ;;  %v544_v43 = vld [vmem:[%s1660_s22 + $0x2e] sm:$0x1]  ;;  %s1520_s10 = smov 110  }
  0x56   : > { %422 = vrot.lane.b32.xlu0 %v421_v27, %s1511_s5  ;;  %v530_v33 = vsel %vm237_vm4, %v529_v7, %v528_v28  ;;  %v461_v34 = vsel %vm232_vm2, %v460_v18, %v459_v29  ;;  %v482_v35 = vrot.slane %v473_v19, 6  ;;  %v485_v36 = vrot.slane %v474_v20, 5  ;;  %v545_v44 = vld [vmem:[%s1660_s22 + $0x3e] sm:$0x1]  ;;  %v542_v49 = vld [vmem:[%s1660_s22 + $0xe] sm:$0x1] }
  0x57   : > { %v531_v39 = vsel %vm239_vm5, %v529_v7, %v530_v33  ;;  %v462_v40 = vsel %vm234_vm3, %v460_v18, %v461_v34  ;;  %v480_v41 = vsel %vm227_vm0, %v479_v30, %v471_v25  ;;  %v501_v42 = vrot.slane %v494_v26, 7  ;;  %v565_v50 = vld [vmem:[%s1660_s22 + $0x1f] sm:$0x1]  ;;  %v566_v55 = vld [vmem:[%s1660_s22 + $0x2f] sm:$0x1]  ;;  %s1521_s11 = smov 92  }
  0x58   : > { %532 = vrot.lane.b32.xlu1 %v531_v39, %s1512_s6  ;;  %v464_v45 = vsel %vm237_vm4, %v463_v24, %v462_v40  ;;  %v481_v46 = vsel %vm229_vm1, %v479_v30, %v480_v41  ;;  %v504_v47 = vrot.slane %v495_v31, 6  ;;  %v507_v48 = vrot.slane %v496_v32, 5  ;;  %v564_v60 = vld [vmem:[%s1660_s22 + $0xf] sm:$0x1]  ;;  %v567_v61 = vld [vmem:[%s1660_s22 + $0x3f] sm:$0x1] }
  0x59   : > { %v465_v51 = vsel %vm239_vm5, %v463_v24, %v464_v45  ;;  %v483_v52 = vsel %vm232_vm2, %v482_v35, %v481_v46  ;;  %v502_v53 = vsel %vm227_vm0, %v501_v42, %v493_v37  ;;  %v550_v54 = vrot.slane %v543_v38, 7  ;;  %s1517_s22 = smov 33   ;;  %v1845_v45 = vld [vmem:[%s1961_s1] sm:$0xff]  ;;  %s214_s5 = scalar_lea.vmem [#allocation7], %s1656_s13 }
  0x5a   : > { %466 = vrot.lane.b32.xlu0 %v465_v51, %s1513_s7  ;;  %v484_v56 = vsel %vm234_vm3, %v482_v35, %v483_v52  ;;  %v503_v57 = vsel %vm229_vm1, %v501_v42, %v502_v53  ;;  %v553_v58 = vrot.slane %v544_v43, 6  ;;  %v556_v59 = vrot.slane %v545_v44, 5  ;;  %v737_v46 = vld [vmem:[%s1962_s2] sm:$0xff]  ;;  %s1156_s6 = sshll.u32 %s214_s5, 4  ;;  %p1973_p11 = scmp.ne.s32.totalorder %s1968_s27, 0  ;;  %s1918_s6 = int_to_ptr.vmem [resolvable:$true] %s1156_s6 }
  0x5b   : > { %v486_v62 = vsel %vm237_vm4, %v485_v36, %v484_v56  ;;  %v505_v63 = vsel %vm232_vm2, %v504_v47, %v503_v57  ;;  %v551_v1 = vsel %vm227_vm0, %v550_v54, %v542_v49  ;;  %v572_v2 = vrot.slane %v565_v50, 7  ;;  %v740_v49 = vld [vmem:[%s1962_s2 + $0x18] sm:$0xff]  ;;  %v739_v50 = vld [vmem:[%s1962_s2 + $0x10] sm:$0xff] }
  0x5c   : > { %v487_v3 = vsel %vm239_vm5, %v485_v36, %v486_v62  ;;  %v506_v4 = vsel %vm234_vm3, %v504_v47, %v505_v63  ;;  %v552_v5 = vsel %vm229_vm1, %v550_v54, %v551_v1  ;;  %v575_v6 = vrot.slane %v566_v55, 6  ;;  %v738_v47 = vld [vmem:[%s1962_s2 + $0x8] sm:$0xff] }
  0x5d   : > { %v508_v7 = vsel %vm237_vm4, %v507_v48, %v506_v4  ;;  %v554_v8 = vsel %vm232_vm2, %v553_v58, %v552_v5  ;;  %v573_v9 = vsel %vm227_vm0, %v572_v2, %v564_v60  ;;  %v578_v10 = vrot.slane %v567_v61, 5 }
  0x5e   : > { %488 = vrot.lane.b32.xlu0 %v487_v3, %s1514_s9  ;;  %v509_v11 = vsel %vm239_vm5, %v507_v48, %v508_v7  ;;  %v555_v12 = vsel %vm234_vm3, %v553_v58, %v554_v8  ;;  %v574_v13 = vsel %vm229_vm1, %v572_v2, %v573_v9  ;;  %vm216_vm6 = vcmask 551936  }
  0x5f   : > { %510 = vrot.lane.b32.xlu1 %v509_v11, %s1515_s14  ;;  %v557_v14 = vsel %vm237_vm4, %v556_v59, %v555_v12  ;;  %v576_v15 = vsel %vm232_vm2, %v575_v6, %v574_v13  ;;  %217 = vst.msk [vmem:[#allocation2 + $0x8] sm:$0xf] %vm216_vm6, %v1501_v0  ;;  %vm244_vm7 = vcmask 281752   ;;  %vm266_vm8 = vcmask 429352   ;;  %s1144_s14 = scalar_lea.sflag [#allocation6], %s1656_s13 }
  0x60   : > { %v558_v16 = vsel %vm239_vm5, %v556_v59, %v557_v14  ;;  %v577_v17 = vsel %vm234_vm3, %v575_v6, %v576_v15  ;;  %vm288_vm9 = vcmask 576952   ;;  %vm310_vm10 = vcmask 724552  }
  0x61   : > { %v579_v18 = vsel %vm237_vm4, %v578_v10, %v577_v17  ;;  %vm332_vm11 = vcmask 872152   ;;  %vm379_vm12 = vcmask 1044472   ;;  %vm380_vm13 = vcmask 121860  }
  0x62   : > { %559 = vrot.lane.b32.xlu0 %v558_v16, %s1516_s20  ;;  %v580_v19 = vsel %vm239_vm5, %v578_v10, %v579_v18  ;;  %vm376_vm14 = vcmask 1039360   ;;  %vm354_vm15 = vcmask 1019752   ;;  %vm381_vm0 = vmor %vm380_vm13, %vm379_vm12  ;;  %vm403_vm1 = vcmask 265352   ;;  %s1430_s20 = scalar_lea.vmem %s1918_s6, 16 }
  0x63   : > { %581 = vrot.lane.b32.xlu1 %v580_v19, %s1517_s22  ;;  %vm425_vm2 = vcmask 412952   ;;  %vm447_vm3 = vcmask 560552   ;;  %vm469_vm4 = vcmask 708152   ;;  %vm538_vm5 = vcmask 1044456   ;;  %p1431_p6 = scmp.ne.s32.totalorder %s1918_s6, %s1430_s20 }
  0x64   : > { %vm539_vm6 = vcmask 105476   ;;  %vm584_vm12 = vcmask 396552   ;;  %vm594_vm13 = vcmask 240640   ;;  %v1523_v48 = vmov 0  }
  0x65   : > { %1398 = vset.pattern.permute.xlu1 %v1523_v48  ;;  %1397 = vset.pattern.permute.xlu0 %v1523_v48  ;;  %v719_v48 = vld [vmem:[%s1961_s1 + $0x8] sm:$0xff]  ;;  %p1432_p12 = pnand %p1431_p6, %p1973_p11 }
  0x67   : > { %p1433_p13 = pneg %p1432_p12 }
  0xb4   : > { %v286_v20 = vpop.permute.xlu1 %285 }
  0xb6   : > { %v242_v21 = vpop.permute.xlu0 %241 }
  0xb7   : > { %245 = vst.msk [vmem:[#allocation2] sm:$0xf] %vm244_vm7, %v242_v21  ;;  %vm491_vm7 = vcmask 855752  }
  0xb8   : > { %v308_v22 = vpop.permute.xlu1 %307 }
  0xba   : > { %v264_v23 = vpop.permute.xlu0 %263 }
  0xbb   : > { %267 = vst.msk [vmem:[#allocation2] sm:$0xf] %vm266_vm8, %v264_v23  ;;  %vm535_vm8 = vcmask 1022976  }
  0xbc   : > { %289 = vst.msk [vmem:[#allocation2] sm:$0xf] %vm288_vm9, %v286_v20  ;;  %vm513_vm9 = vcmask 1003352  }
  0xbd   : > { %v330_v24 = vpop.permute.xlu1 %329  ;;  %311 = vst.msk [vmem:[#allocation2] sm:$0xf] %vm310_vm10, %v308_v22  ;;  %vm540_vm10 = vmor %vm539_vm6, %vm538_vm5  ;;  %vm611_vm5 = vcmask 244740   ;;  %vm694_vm6 = vcmask 744448  }
  0xbe   : > { %333 = vst.msk [vmem:[#allocation2] sm:$0xf] %vm332_vm11, %v330_v24  ;;  %vm562_vm11 = vcmask 248952  }
  0xbf   : > { %v374_v25 = vpop.permute.xlu0 %373 }
  0xc0   : > { %v375_v26 = vrot.slane %v374_v25, 4 }
  0xc1   : > { %v401_v27 = vpop.permute.xlu1 %400 }
  0xc2   : > { %v377_v29 = vsel %vm376_vm14, %v375_v26, %v374_v25 }
  0xc3   : > { %v352_v28 = vpop.permute.xlu0 %351 }
  0xc4   : > { %355 = vst.msk [vmem:[#allocation2] sm:$0xf] %vm354_vm15, %v352_v28  ;;  %vm761_vm15 = vcmask 293888  }
  0xc5   : > { %382 = vst.msk [vmem:[#allocation2] sm:$0xff] %vm381_vm0, %v377_v29  ;;  %1274 = vmatprep.mubr.msk.f32.mxu1 %vm761_vm15, %v1845_v45  ;;  %vm619_vm0 = vcmask 1031168  }
  0xc6   : > { %v445_v30 = vpop.permute.xlu1 %444  ;;  %404 = vst.msk [vmem:[#allocation2 + $0x4] sm:$0xf] %vm403_vm1, %v401_v27  ;;  %vm634_vm1 = vcmask 900096  }
  0xc8   : > { %v423_v31 = vpop.permute.xlu0 %422 }
  0xc9   : > { %426 = vst.msk [vmem:[#allocation2 + $0x4] sm:$0xf] %vm425_vm2, %v423_v31  ;;  %vm649_vm2 = vcmask 891904  }
  0xca   : > { %448 = vst.msk [vmem:[#allocation2 + $0x4] sm:$0xf] %vm447_vm3, %v445_v30  ;;  %v533_v32 = vpop.permute.xlu1 %532  ;;  %vm679_vm3 = vcmask 752640  }
  0xcb   : > { %v534_v34 = vrot.slane %v533_v32, 4 }
  0xcc   : > { %v467_v33 = vpop.permute.xlu0 %466 }
  0xcd   : > { %470 = vst.msk [vmem:[#allocation2 + $0x4] sm:$0xf] %vm469_vm4, %v467_v33  ;;  %v536_v37 = vsel %vm535_vm8, %v534_v34, %v533_v32  ;;  %vm664_vm4 = vcmask 883712   ;;  %vm1525_vm8 = vmmov 0  }
  0xd0   : > { %v489_v35 = vpop.permute.xlu0 %488 }
  0xd1   : > { %492 = vst.msk [vmem:[#allocation2 + $0x4] sm:$0xf] %vm491_vm7, %v489_v35  ;;  %v511_v36 = vpop.permute.xlu1 %510  ;;  %vm774_vm7 = vcmask 1043456  }
  0xd2   : > { %514 = vst.msk [vmem:[#allocation2 + $0x4] sm:$0xf] %vm513_vm9, %v511_v36  ;;  %vm986_vm9 = vcmask 244736  }
  0xd3   : > { %541 = vst.msk [vmem:[#allocation2 + $0x4] sm:$0xff] %vm540_vm10, %v536_v37  ;;  %vm1902_vm10 = vmpackc.low %vm986_vm9, %vm986_vm9 }
  0xd4   : > { %v560_v38 = vpop.permute.xlu0 %559 }
  0xd5   : > { %563 = vst.msk [vmem:[#allocation2 + $0x8] sm:$0xf] %vm562_vm11, %v560_v38  ;;  %v582_v39 = vpop.permute.xlu1 %581  ;;  %vm1141_vm11 = vcmask 253952  }
  0xd6   : > { %585 = vst.msk [vmem:[#allocation2 + $0x8] sm:$0xf] %vm584_vm12, %v582_v39 }
  0xda   : > { %v586_v40 = vld [vmem:[#allocation2] sm:$0xff] }
  0xdb   : > { %613 = vrot.lane.b32.xlu1 %v586_v40, %s1518_s26  ;;  %592 = vst [vmem:[#allocation3] sm:$0xf] %v586_v40  ;;  %600 = vrot.lane.b32.xlu0 %v586_v40, %s1507_s23  ;;  %v590_v41 = vcombine.high %v586_v40, %v586_v40  ;;  %v596_v43 = vcombine.low %v586_v40, %v586_v40 }
  0xdd   : > { %593 = vst [vmem:[#allocation3 + $0x8] sm:$0xf] %v590_v41  ;;  %v587_v42 = vld [vmem:[#allocation2 + $0x8] sm:$0xf] }
  0xde   : > { %595 = vst.msk [vmem:[#allocation3 + $0x10] sm:$0xf] %vm594_vm13, %v587_v42  ;;  %v597_v44 = vcombine.low %v587_v42, %v587_v42 }
  0xdf   : > { %660 = vrot.lane.b32.xlu1 %v586_v40, %s1519_s8  ;;  %630 = vrot.lane.b32.xlu0 %v586_v40, %s1520_s10 }
  0xe3   : > { %690 = vrot.lane.b32.xlu1 %v586_v40, %s1506_s12  ;;  %615 = vrot.lane.b32.xlu0 %v590_v41, %s1518_s26 }
  0xe7   : > { %643 = vrot.lane.b32.xlu1 %v586_v40, %s1509_s29  ;;  %598 = vrot.lane.b32.xlu0 %v596_v43, %s1507_s23 }
  0xeb   : > { %628 = vrot.lane.b32.xlu0 %v596_v43, %s1520_s10  ;;  %617 = vrot.lane.b32.xlu1 %v587_v42, %s1518_s26 }
  0xef   : > { %647 = vrot.lane.b32.xlu0 %v587_v42, %s1509_s29  ;;  %645 = vrot.lane.b32.xlu1 %v590_v41, %s1509_s29  ;;  %s1522_s29 = smov 90  }
  0xf3   : > { %677 = vrot.lane.b32.xlu0 %v587_v42, %s1521_s11  ;;  %675 = vrot.lane.b32.xlu1 %v590_v41, %s1521_s11 }
  0xf7   : > { %658 = vrot.lane.b32.xlu0 %v596_v43, %s1519_s8  ;;  %602 = vrot.lane.b32.xlu1 %v597_v44, %s1507_s23  ;;  %s1246_s23 = sshll.u32 %s1573_s19, 4  ;;  %s1526_s19 = smov [#allocation7]  }
  0xf8   : > { %s1916_s9 = scalar_lea.hbm %s1964_s4, %s1246_s23  ;;  %s1434_s22 = sshll.u32 %s1526_s19, 4  ;;  %s1435_s22 = int_to_ptr.vmem [resolvable:$false] %s1434_s22 }
  0xf9   : > { %s1436_s26 = scalar_lea.vmem %s1435_s22, 32  ;;  %p1437_p8 = scmp.lt.s32.totalorder %s1918_s6, %s1435_s22 }
  0xfa   : > { %p1438_p10 = scmp.lt.s32.totalorder %s1436_s26, %s1430_s20 }
  0xfb   : > { %662 = vrot.lane.b32.xlu0 %v597_v44, %s1519_s8  ;;  %632 = vrot.lane.b32.xlu1 %v597_v44, %s1520_s10 }
  0xfc   : > { %p1439_p0 = por %p1438_p10, %p1437_p8 }
  0xfe   : > { %p1440_p2 = pnand %p1439_p0, %p1433_p13 }
  0xff   : > { %692 = vrot.lane.b32.xlu0 %v597_v44, %s1506_s12  ;;  %673 = vrot.lane.b32.xlu1 %v586_v40, %s1521_s11 }
 0x103   : > { %688 = vrot.lane.b32.xlu0 %v596_v43, %s1506_s12  ;;  %705 = vrot.lane.b32.xlu1 %v590_v41, %s1522_s29 }
 0x107   : > { %707 = vrot.lane.b32.xlu0 %v587_v42, %s1522_s29  ;;  %703 = vrot.lane.b32.xlu1 %v586_v40, %s1522_s29 }
 0x10b   : > { %743 = vperm.xlu0 %1397, %v737_v46   ;;  %748 = vperm.xlu1 %1398, %v738_v47  }
 0x10f   : > { %758 = vperm.xlu0 %1397, %v740_v49   ;;  %753 = vperm.xlu1 %1398, %v739_v50   ;;  %v720_v50 = vld [vmem:[%s1961_s1 + $0x10] sm:$0xff] }
 0x14d   : > { %v614_v51 = vpop.permute.xlu1 %613  ;;  %v601_v52 = vpop.permute.xlu0 %600 }
 0x151   : > { %v661_v53 = vpop.permute.xlu1 %660  ;;  %v631_v54 = vpop.permute.xlu0 %630 }
 0x155   : > { %v691_v55 = vpop.permute.xlu1 %690  ;;  %v616_v56 = vpop.permute.xlu0 %615 }
 0x156   : > { %v620_v57 = vsel %vm619_vm0, %v614_v51, %v616_v56 }
 0x157   : > { %625 = vst [vmem:[#allocation3 + $0x18] sm:$0xf] %v620_v57 }
 0x159   : > { %v644_v58 = vpop.permute.xlu1 %643  ;;  %v599_v59 = vpop.permute.xlu0 %598 }
 0x15a   : > { %v604_v60 = vsel %vm376_vm14, %v599_v59, %v601_v52 }
 0x15b   : > { %609 = vst [vmem:[#allocation3] sm:$0xf0] %v604_v60 }
 0x15d   : > { %v629_v61 = vpop.permute.xlu0 %628  ;;  %v618_v62 = vpop.permute.xlu1 %617 }
 0x15e   : > { %v635_v63 = vsel %vm634_vm1, %v629_v61, %v631_v54  ;;  %v621_v1 = vsel %vm619_vm0, %v616_v56, %v618_v62  ;;  %627 = vst.msk [vmem:[#allocation3 + $0x28] sm:$0xf] %vm594_vm13, %v618_v62 }
 0x15f   : > { %640 = vst [vmem:[#allocation3 + $0x18] sm:$0xf0] %v635_v63  ;;  %626 = vst [vmem:[#allocation3 + $0x20] sm:$0xf] %v621_v1 }
 0x161   : > { %v648_v2 = vpop.permute.xlu0 %647  ;;  %v646_v3 = vpop.permute.xlu1 %645 }
 0x162   : > { %657 = vst.msk [vmem:[#allocation3 + $0x40] sm:$0xf] %vm594_vm13, %v648_v2  ;;  %v650_v4 = vsel %vm649_vm2, %v644_v58, %v646_v3  ;;  %v651_v5 = vsel %vm649_vm2, %v646_v3, %v648_v2  ;;  %v722_v31 = vld [vmem:[#allocation3] sm:$0xff] }
 0x163   : > { %655 = vst [vmem:[#allocation3 + $0x30] sm:$0xf] %v650_v4  ;;  %656 = vst [vmem:[#allocation3 + $0x38] sm:$0xf] %v651_v5 }
 0x165   : > { %v678_v6 = vpop.permute.xlu0 %677  ;;  %v676_v7 = vpop.permute.xlu1 %675 }
 0x166   : > { %687 = vst.msk [vmem:[#allocation3 + $0x58] sm:$0xf] %vm594_vm13, %v678_v6  ;;  %v681_v8 = vsel %vm679_vm3, %v676_v7, %v678_v6  ;;  %v725_v25 = vld [vmem:[#allocation3 + $0x18] sm:$0xff] }
 0x167   : > { %686 = vst [vmem:[#allocation3 + $0x50] sm:$0xf] %v681_v8  ;;  %v1293_v32 = vpack.c.bf16 %v725_v25, %v722_v31 }
 0x169   : > { %v659_v9 = vpop.permute.xlu0 %658  ;;  %v603_v10 = vpop.permute.xlu1 %602 }
 0x16a   : > { %v665_v11 = vsel %vm664_vm4, %v659_v9, %v661_v53  ;;  %v605_v12 = vsel %vm376_vm14, %v601_v52, %v603_v10  ;;  %612 = vst.msk [vmem:[#allocation3 + $0x10] sm:$0xf0] %vm611_vm5, %v603_v10  ;;  %vm709_vm14 = vcmask 736256   ;;  %v721_v52 = vld [vmem:[%s1961_s1 + $0x18] sm:$0xff] }
 0x16b   : > { %670 = vst [vmem:[#allocation3 + $0x30] sm:$0xf0] %v665_v11  ;;  %610 = vst [vmem:[#allocation3 + $0x8] sm:$0xf0] %v605_v12 }
 0x16d   : > { %v663_v13 = vpop.permute.xlu0 %662  ;;  %v633_v14 = vpop.permute.xlu1 %632 }
 0x16e   : > { %v666_v15 = vsel %vm664_vm4, %v661_v53, %v663_v13  ;;  %672 = vst.msk [vmem:[#allocation3 + $0x40] sm:$0xf0] %vm611_vm5, %v663_v13  ;;  %v636_v16 = vsel %vm634_vm1, %v631_v54, %v633_v14  ;;  %642 = vst.msk [vmem:[#allocation3 + $0x28] sm:$0xf0] %vm611_vm5, %v633_v14  ;;  %v1524_v53 = vmov 0.0|0.0   ;;  %v972_v54 = vlaneseq }
 0x16f   : > { %671 = vst [vmem:[#allocation3 + $0x38] sm:$0xf0] %v666_v15  ;;  %641 = vst [vmem:[#allocation3 + $0x20] sm:$0xf0] %v636_v16 }
 0x171   : > { %v693_v17 = vpop.permute.xlu0 %692  ;;  %v674_v18 = vpop.permute.xlu1 %673  ;;  %v724_v23 = vld [vmem:[#allocation3 + $0x10] sm:$0xff] }
 0x172   : > { %v696_v19 = vsel %vm694_vm6, %v691_v55, %v693_v17  ;;  %702 = vst.msk [vmem:[#allocation3 + $0x58] sm:$0xf0] %vm611_vm5, %v693_v17  ;;  %v680_v20 = vsel %vm679_vm3, %v674_v18, %v676_v7  ;;  %v723_v28 = vld [vmem:[#allocation3 + $0x8] sm:$0xff]  ;;  %v728_v43 = vld [vmem:[#allocation3 + $0x30] sm:$0xff] }
 0x173   : > { %701 = vst [vmem:[#allocation3 + $0x50] sm:$0xf0] %v696_v19  ;;  %685 = vst [vmem:[#allocation3 + $0x48] sm:$0xf] %v680_v20 }
 0x175   : > { %v689_v21 = vpop.permute.xlu0 %688  ;;  %v706_v22 = vpop.permute.xlu1 %705  ;;  %v727_v24 = vld [vmem:[#allocation3 + $0x28] sm:$0xff]  ;;  %v730_v35 = vld [vmem:[#allocation3 + $0x40] sm:$0xff] }
 0x176   : > { %v695_v26 = vsel %vm694_vm6, %v689_v21, %v691_v55  ;;  %v1299_v27 = vpack.c.bf16 %v727_v24, %v724_v23  ;;  %v726_v29 = vld [vmem:[#allocation3 + $0x20] sm:$0xff]  ;;  %v729_v40 = vld [vmem:[#allocation3 + $0x38] sm:$0xff]  ;;  %v973_v55 = vshrl.u32 %v972_v54, 7 }
 0x177   : > { %700 = vst [vmem:[#allocation3 + $0x48] sm:$0xf0] %v695_v26  ;;  %v1291_v30 = vpack.c.bf16 %v726_v29, %v723_v28 }
 0x178   : > { %1300 = vmatprep.subr.bf16.mxu1 %v1299_v27  ;;  %v974_v56 = vsub.s32 0, %v973_v55  ;;  %v978_v57 = vsub.s32 1, %v973_v55  ;;  %v982_v58 = vsub.s32 2, %v973_v55 }
 0x179   : > { %v708_v33 = vpop.permute.xlu0 %707  ;;  %1292 = vmatprep.subr.bf16.mxu0 %v1291_v30  ;;  %v704_v34 = vpop.permute.xlu1 %703  ;;  %1302 = vmatpush3.bf16.msra.mxu1 %v1299_v27  ;;  %v733_v36 = vld [vmem:[#allocation3 + $0x58] sm:$0xff] }
 0x17a   : > { %v711_v37 = vsel %vm709_vm14, %v706_v22, %v708_v33  ;;  %717 = vst.msk [vmem:[#allocation3 + $0x70] sm:$0xf] %vm594_vm13, %v708_v33  ;;  %v710_v38 = vsel %vm709_vm14, %v704_v34, %v706_v22  ;;  %1294 = vmatpush1.bf16.msra.mxu0 %v1293_v32  ;;  %v1303_v39 = vpack.c.bf16 %v733_v36, %v730_v35  ;;  %v732_v41 = vld [vmem:[#allocation3 + $0x50] sm:$0xff] }
 0x17b   : > { %716 = vst [vmem:[#allocation3 + $0x68] sm:$0xf] %v711_v37  ;;  %715 = vst [vmem:[#allocation3 + $0x60] sm:$0xf] %v710_v38  ;;  %v1295_v42 = vpack.c.bf16 %v732_v41, %v729_v40 }
 0x17c   : > { %1304 = vmatprep.subr.bf16.mxu1 %v1303_v39 }
 0x17d   : > { %1296 = vmatprep.subr.bf16.mxu0 %v1295_v42  ;;  %1306 = vmatpush3.bf16.msra.mxu1 %v1303_v39 }
 0x17e   : > { %v731_v44 = vld [vmem:[#allocation3 + $0x48] sm:$0xff] }
 0x17f   : > { %v1297_v46 = vpack.c.bf16 %v731_v44, %v728_v43 }
 0x181   : > { %1298 = vmatpush1.bf16.msra.mxu0 %v1297_v46  ;;  %v736_v47 = vld [vmem:[#allocation3 + $0x70] sm:$0xf] }
 0x182   : > { %1272 = vmatprep.subr.msk.mxu1 %vm774_vm7, %v736_v47  ;;  %v735_v49 = vld [vmem:[#allocation3 + $0x68] sm:$0xf]  ;;  %v734_v51 = vld [vmem:[#allocation3 + $0x60] sm:$0xf] }
 0x183   : > { %1230 = vmatprep.subr.msk.mxu0 %vm774_vm7, %v735_v49  ;;  %1273 = vmatpush3.msk.msra.mxu1 %vm774_vm7, %v736_v47 }
 0x184   : > { %1275 = vmatmul.mubr.msk.f32.vlgmr.msra.gmra.mrb[0].mxu1 %vm761_vm15, %v719_v48 }
 0x185   : > { %1231 = vmatpush1.msk.msra.mxu0 %vm774_vm7, %v734_v51  ;;  %1277 = vmatprep.mubr.msk.f32.mxu1 %vm761_vm15, %v720_v50 }
 0x186   : > { %1232 = vmatmul.mubr.msk.f32.vlgmr.msra.gmra.mrb[0].mxu0 %vm761_vm15, %v1845_v45  ;;  %1315 = vmatprep.subr.bf16.mxu0 %v1524_v53  ;;  %v970_v45 = vld [vmem:[%s1963_s3] sm:$0x7] }
 0x187   : > { %854 = vmatprep.mubr.f32.mxu0 %v1501_v0  ;;  %v975_v59 = vrot.slane %v970_v45, %v974_v56  ;;  %v979_v60 = vrot.slane %v970_v45, %v978_v57  ;;  %v983_v61 = vrot.slane %v970_v45, %v982_v58 }
 0x188   : > { %1278 = vmatmul.mubr.msk.f32.gmra.mrb[2].mxu1 %vm761_vm15, %v721_v52 }
 0x189   : > { %1065 = vmatprep.mubr.f32.mxu1 %v979_v60 }
 0x18a   : > { %1233 = vmatmul.mubr.msk.f32.gmra.mrb[2].mxu0 %vm761_vm15, %v719_v48  ;;  %v744_v62 = vpop.permute.xlu0 %743  ;;  %v749_v63 = vpop.permute.xlu1 %748 }
 0x18b   : > { %860 = vmatprep.mubr.f32.mxu0 %v1501_v0 }
 0x18e   : > { %1234 = vmatmul.mubr.msk.f32.gmra.mrb[4].mxu0 %vm761_vm15, %v720_v50  ;;  %v759_v6 = vpop.permute.xlu0 %758  ;;  %v754_v8 = vpop.permute.xlu1 %753 }
 0x18f   : > { %866 = vmatprep.mubr.f32.mxu0 %v1501_v0 }
 0x192   : > { %1235 = vmatmul.mubr.msk.f32.gmra.mrb[6].mxu0 %vm761_vm15, %v721_v52 }
 0x193   : > { %1288 = vmatprep.mubr.msk.f32.mxu0 %vm1525_vm8, %v1501_v0 }
 0x257   : > { %v1276_v1 = vpop.f32.mrb[0].mxu1 }
 0x258   : > { %v945_v2 = vadd.f32 %v1276_v1, %v749_v63  ;;  %v939_v3 = vpop.f32.mrb[1].mxu1 }
 0x259   : > { %v940_v4 = vadd.f32 %v939_v3, %v744_v62  ;;  %v850_v5 = vpop.f32.mrb[0].mxu0 }
 0x25a   : > { %v963_v0 = vmax.f32 %v945_v2, 0.0  ;;  %v852_v7 = vpop.f32.mrb[1].mxu0  ;;  %v851_v11 = vadd.f32 %v850_v5, %v744_v62 }
 0x25b   : > { %v960_v9 = vmax.f32 %v940_v4, 0.0  ;;  %v1279_v10 = vpop.f32.mrb[2].mxu1  ;;  %v853_v16 = vadd.f32 %v852_v7, %v744_v62 }
 0x25c   : > { %v955_v12 = vadd.f32 %v1279_v10, %v759_v6  ;;  %v949_v13 = vpop.f32.mrb[3].mxu1  ;;  %v958_v24 = vmax.f32 %v851_v11, 0.0 }
 0x25d   : > { %v1316_v15 = vpack.c.bf16 %v963_v0, %v960_v9  ;;  %v856_v17 = vpop.f32.mrb[2].mxu0  ;;  %v950_v18 = vadd.f32 %v949_v13, %v754_v8  ;;  %v959_v26 = vmax.f32 %v853_v16, 0.0 }
 0x25e   : > { %v857_v19 = vadd.f32 %v856_v17, %v749_v63  ;;  %v969_v20 = vmax.f32 %v955_v12, 0.0  ;;  %v858_v21 = vpop.f32.mrb[3].mxu0 }
 0x25f   : > { %v859_v22 = vadd.f32 %v858_v21, %v749_v63  ;;  %v966_v23 = vmax.f32 %v950_v18, 0.0  ;;  %1318 = vmatpush3.bf16.xpose.msk.msra.mxu0 %vm1902_vm10, %v1316_v15 }
 0x260   : > { %v961_v25 = vmax.f32 %v857_v19, 0.0  ;;  %1319 = vmatprep.subr.bf16.mxu0 %v1524_v53 }
 0x261   : > { %v962_v27 = vmax.f32 %v859_v22, 0.0  ;;  %v1320_v28 = vpack.c.bf16 %v969_v20, %v966_v23  ;;  %v862_v29 = vpop.f32.mrb[4].mxu0 }
 0x262   : > { %v1309_v30 = vpack.c.bf16 %v961_v25, %v958_v24  ;;  %v864_v31 = vpop.f32.mrb[5].mxu0  ;;  %v863_v33 = vadd.f32 %v862_v29, %v754_v8 }
 0x263   : > { %v1307_v32 = vpack.c.bf16 %v962_v27, %v959_v26  ;;  %v865_v34 = vadd.f32 %v864_v31, %v754_v8 }
 0x264   : > { %v964_v39 = vmax.f32 %v863_v33, 0.0 }
 0x265   : > { %v868_v35 = vpop.f32.mrb[6].mxu0  ;;  %1308 = vmatprep.subr.bf16.mxu1 %v1307_v32  ;;  %v965_v41 = vmax.f32 %v865_v34, 0.0 }
 0x266   : > { %v869_v36 = vadd.f32 %v868_v35, %v759_v6  ;;  %v870_v37 = vpop.f32.mrb[7].mxu0  ;;  %1310 = vmatpush1.bf16.xpose.msra.mxu1 %v1309_v30 }
 0x267   : > { %v871_v38 = vadd.f32 %v870_v37, %v759_v6  ;;  %1322 = vmatpush3.bf16.xpose.msk.msra.mxu0 %vm1902_vm10, %v1320_v28 }
 0x268   : > { %v967_v40 = vmax.f32 %v869_v36, 0.0 }
 0x269   : > { %v968_v42 = vmax.f32 %v871_v38, 0.0 }
 0x26a   : > { %v1313_v43 = vpack.c.bf16 %v967_v40, %v964_v39 }
 0x26b   : > { %v1311_v44 = vpack.c.bf16 %v968_v42, %v965_v41 }
 0x26d   : > { %1312 = vmatprep.subr.bf16.mxu1 %v1311_v44 }
 0x26e   : > { %1314 = vmatpush1.bf16.xpose.msra.mxu1 %v1313_v43  ;;  %1289 = vmatmul.mubr.msk.f32.vlgmr.msra.gmra.mrb[8].mxu0 %vm986_vm9, %v983_v61 }
 0x275   : > { %1066 = vmatmul.mubr.f32.vlgmr.msra.gmra.mrb[4].mxu1 %v975_v59 }
 0x341   : > { %v1137_v46 = vpop.f32.mrb[8].mxu0 }
 0x342   : > { %v1290_v47 = vpop.f32.mrb[9].mxu0 }
 0x348   : > { %v1067_v48 = vpop.f32.mrb[4].mxu1 }
 0x349   : > { %v1138_v49 = vadd.f32 %v1137_v46, %v1067_v48  ;;  %v1069_v50 = vpop.f32.mrb[5].mxu1 }
 0x34b   : > { %1142 = vst.msk [vmem:[%s214_s5] sm:$0x1] %vm1141_vm11, %v1138_v49 }
 0x34c   : > { %1443 = shalt.err (!%p1440_p2)
}
 0x34d   : > { %s1444_s13 = scalar_lea.hbm %s1916_s9, 16  ;;  %s1448_s11 = scalar_lea.hbm %s1964_s4, 32 }
 0x34e   : > { %p1445_p4 = scmp.ne.s32.totalorder %s1916_s9, %s1444_s13  ;;  %p1449_p9 = scmp.lt.u32.totalorder %s1916_s9, %s1964_s4 }
 0x34f   : > { %p1450_p1 = scmp.lt.u32.totalorder %s1448_s11, %s1444_s13  ;;  %p1452_p6 = scmp.lt.u32.totalorder %s1444_s13, %s1916_s9 }
 0x350   : > { %p1446_p5 = pnand %p1445_p4, %p1973_p11 }
 0x351   : > { %p1451_p3 = por %p1450_p1, %p1449_p9 }
 0x352   : > { %p1447_p7 = pneg %p1446_p5 }
 0x353   : > { %p1453_p12 = por %p1452_p6, %p1451_p3 }
 0x355   : > { %p1454_p13 = pnand %p1453_p12, %p1447_p7 }
 0x357   : > { %1457 = shalt.err (!%p1454_p13)
}
 0x358   : > { %1326 = dma.vmem_to_hbm [thread:$0]  (%p1973_p11), %s1918_s6, 16, %s1916_s9, %s1144_s14  }
 0x359 PF: > { %s1168_s29 = sand.u32 1, %s1484_s15   ;;  %p1974_p8 = scmp.ne.s32.totalorder %s1969_s28, 0 }
 0x35a   : > { %p1975_p10 = scmp.ge.s32.totalorder %s1496_s18, 2  ;;  %s1169_s23 = scalar_lea.sflag [#allocation6], %s1168_s29 }
 0x35c   : > { %p1333_p0 = pnand %p1975_p10, %p1974_p8 }
 0x35e   : > { %1479 = dma.done.wait (!%p1333_p0), %s1169_s23, 16  }
 0x35f   : > { %1481 = vsyncadd (!%p1333_p0), %s1169_s23, 4294967280  ;;  %p17_p2 = scmp.ge.s32.totalorder %s1577_s21, 4   ;;  %s1976_s15 = smov %s1488_s16 }
 0x360   : > { %s1977_s16 = smov %s1492_s17  ;;  %s1978_s17 = smov %s1589_s24 }
 0x361   : > { %s1979_s18 = smov %s1577_s21  ;;  %19 = sbr.rel (!%p17_p2) target bundleno = 5 (0x5), region = 81 }
 0x368   :  { %1173 = vsyncpa [#allocation5], 1 }
 0x369   :  { %1175 = vsyncpa [#allocation5 + $0x1], 1 }
 0x36a   :  { %1176 = vsyncpa [#allocation6], 1 }
 0x36b   :  { %1178 = vsyncpa [#allocation6 + $0x1], 1 }

</bundles_post_ra>
